<compile_context>
chip_gen: v6e
topology: v6e:2x2x1
jax: 0.10.0
libtpu: 0.0.40
codegen_flags: <defaults>
</compile_context>

<pallas_src>
import jax
import jax.numpy as jnp
from jax.experimental import pallas as pl
from jax.experimental.pallas import tpu as pltpu

NEG_SLOPE = 0.01          # nn.LeakyReLU default negative_slope
DEFAULT_TILE_B = 8192     # batch samples (lanes) per grid step; intermediates ~6 MiB,
                          # safe under v5e's 16 MiB scoped-VMEM default and v7x's 64 MiB VMEM


def _leaky_relu(x):
    # Valid because 0 < NEG_SLOPE < 1: max(x, s*x) == (x if x > 0 else s*x).
    return jnp.maximum(x, NEG_SLOPE * x)


def confnn_kernel(x_ref, w1_ref, b1_ref, w3_ref, b3_ref, w2_ref, b2_ref, o_ref):
    # Batch on lanes: x tile is (1, T). Single cheap row cast to bf16.
    x_row = x_ref[...].astype(jnp.bfloat16)                       # (1, T)

    # Layer 1: Linear(1, 64). K=1 matmul == rank-1 outer product -> VPU, bf16 vregs.
    h = w1_ref[...] * x_row + b1_ref[...]                         # (64,1)*(1,T)+(64,1) -> (64,T) bf16
    h = _leaky_relu(h)

    # Layer 3: Linear(64, 64). The only MXU matmul: bf16 operands, f32 accumulate.
    t = jnp.dot(w3_ref[...], h,
                preferred_element_type=jnp.float32) + b3_ref[...]  # (64,64)@(64,T) -> (64,T) f32
    t = _leaky_relu(t)

    # Layer 2: Linear(64, 1) kept OFF the MXU: broadcast-mul (VPU) + sublane reduce (XLU).
    out = jnp.sum(w2_ref[...] * t, axis=0, keepdims=True) + b2_ref[...]   # (1, T) f32
    o_ref[...] = out.astype(o_ref.dtype)


def _round_up(x, m):
    return ((x + m - 1) // m) * m


def confnn_forward(x, params, *, tile_b=DEFAULT_TILE_B):
    """x: (N, 1) float32 -> (N, 1) float32 (same semantics as ConfNN.forward)."""
    w1, b1, w3, b3, w2, b2 = params
    N = x.shape[0]

    # ---- pick the lane tile -------------------------------------------------
    n128 = _round_up(max(N, 1), 128)            # minimum lane-dense (128-multiple) size
    if n128 <= 512:
        tile = n128                             # tiny batch: one small lane-dense tile
    else:
        # At least 2 grid steps so megacore (v7x) sharding + double-buffering engage;
        # capped at tile_b so per-step VMEM stays bounded for any N.
        tile = min(tile_b, _round_up((n128 + 1) // 2, 512))
    grid_b = pl.cdiv(n128, tile)
    n_pad = grid_b * tile

    # ---- weight prep (done once, outside the kernel) -------------------------
    w1_bf = w1.astype(jnp.bfloat16)             # (64, 1)
    b1_bf = b1.astype(jnp.bfloat16)             # (64, 1)
    w3_bf = w3.astype(jnp.bfloat16)             # (64, 64)
    w2_col = w2.reshape(64, 1).astype(jnp.float32)   # (64, 1) column for the VPU layer-2
    b3_f = b3.astype(jnp.float32)               # (64, 1)
    b2_f = b2.astype(jnp.float32)               # (1, 1)

    # Batch-on-lanes layout: (1, N_pad). Padded tail lanes compute garbage (leaky(b1)-
    # derived) that is sliced away below and never read.
    x_lane = jnp.pad(x.reshape(-1), (0, n_pad - N)).reshape(1, n_pad)

    # Grid-invariant specs -> weights/biases fetched once, VMEM-resident across steps.
    const = lambda a: pl.BlockSpec(a.shape, lambda i: (0,) * a.ndim)

    out_lane = pl.pallas_call(
        confnn_kernel,
        out_shape=jax.ShapeDtypeStruct((1, n_pad), jnp.float32),
        grid=(grid_b,),
        in_specs=[
            pl.BlockSpec((1, tile), lambda i: (0, i)),   # x: tiled along lanes
            const(w1_bf), const(b1_bf), const(w3_bf),
            const(b3_f), const(w2_col), const(b2_f),
        ],
        out_specs=pl.BlockSpec((1, tile), lambda i: (0, i)),
        compiler_params=pltpu.CompilerParams(
            dimension_semantics=("parallel",),           # megacore sharding on v7x
            vmem_limit_bytes=32 << 20,                   # headroom on v5e's 16 MiB default
        ),
    )(x_lane, w1_bf, b1_bf, w3_bf, b3_f, w2_col, b2_f)

    return out_lane.reshape(-1)[:N].reshape(N, 1)


def init_params(key):
    """PyTorch-style default Linear init (uniform +/- 1/sqrt(fan_in)), PyTorch layout."""
    ks = jax.random.split(key, 6)

    def lin(kw, kb, fan_in, fan_out):
        bound = 1.0 / jnp.sqrt(jnp.float32(fan_in))
        w = jax.random.uniform(kw, (fan_out, fan_in), jnp.float32, -bound, bound)
        b = jax.random.uniform(kb, (fan_out, 1), jnp.float32, -bound, bound)
        return w, b

    w1, b1 = lin(ks[0], ks[1], 1, 64)    # layer1: Linear(1, 64)
    w3, b3 = lin(ks[2], ks[3], 64, 64)   # layer3: Linear(64, 64)
    w2, b2 = lin(ks[4], ks[5], 64, 1)    # layer2: Linear(64, 1)
    return (w1, b1, w3, b3, w2, b2)


def reference_forward(x, params):
    """Pure-JAX f32 reference (PyTorch-layout weights: y = x @ W.T + b)."""
    w1, b1, w3, b3, w2, b2 = params

    def leaky(v):
        return jnp.where(v > 0, v, NEG_SLOPE * v)

    h = leaky(x @ w1.T + b1.reshape(1, -1))
    h = leaky(h @ w3.T + b3.reshape(1, -1))
    return h @ w2.T + b2.reshape(1, -1)


if __name__ == "__main__":
    key = jax.random.PRNGKey(0)
    k_x, k_x2, k_p = jax.random.split(key, 3)
    params = init_params(k_p)

    # Small batch, not a multiple of 128 -> single-tile path + padding.
    N1 = 300
    x1 = jax.random.normal(k_x, (N1, 1), jnp.float32)
    out1 = confnn_forward(x1, params)
    jax.block_until_ready(out1)

    # Larger batch -> multi-step grid (grid_b >= 2) + padding.
    N2 = 1500
    x2 = jax.random.normal(k_x2, (N2, 1), jnp.float32)
    out2 = confnn_forward(x2, params)
    jax.block_until_ready(out2)

    # Layer-1/layer-3 run with bf16 operands (f32 accumulate), so allow a loose tolerance.
    for out, x, n in ((out1, x1, N1), (out2, x2, N2)):
        ref = reference_forward(x, params)
        assert out.shape == (n, 1)
        max_err = float(jnp.max(jnp.abs(out - ref)))
        assert jnp.allclose(out, ref, atol=5e-2, rtol=5e-2), (
            f"mismatch vs reference at N={n} (max abs err={max_err})")

    print("KERNEL_OK")
</pallas_src>

<mosaic_0001>
module attributes {stable_mosaic.version = 11 : i64} {
  func.func @confnn_kernel(%arg0: i32, %arg1: memref<1x384xf32, #tpu.memory_space<vmem>>, %arg2: memref<64x1xbf16, #tpu.memory_space<vmem>>, %arg3: memref<64x1xbf16, #tpu.memory_space<vmem>>, %arg4: memref<64x64xbf16, #tpu.memory_space<vmem>>, %arg5: memref<64x1xf32, #tpu.memory_space<vmem>>, %arg6: memref<64x1xf32, #tpu.memory_space<vmem>>, %arg7: memref<1x1xf32, #tpu.memory_space<vmem>>, %arg8: memref<1x384xf32, #tpu.memory_space<vmem>>) attributes {dimension_semantics = [#tpu.dimension_semantics<parallel>], iteration_bounds = array<i64: 1>, scalar_prefetch = 0 : i64, scratch_operands = 0 : i64, tpu.core_type = #tpu.core_type<tc>, window_params = [{transform_indices = @transform_0, window_bounds = array<i64: 1, 384>}, {pipeline_mode = #tpu.pipeline_mode<synchronous>, transform_indices = @transform_1, window_bounds = array<i64: 64, 1>}, {pipeline_mode = #tpu.pipeline_mode<synchronous>, transform_indices = @transform_2, window_bounds = array<i64: 64, 1>}, {pipeline_mode = #tpu.pipeline_mode<synchronous>, transform_indices = @transform_3, window_bounds = array<i64: 64, 64>}, {pipeline_mode = #tpu.pipeline_mode<synchronous>, transform_indices = @transform_4, window_bounds = array<i64: 64, 1>}, {pipeline_mode = #tpu.pipeline_mode<synchronous>, transform_indices = @transform_5, window_bounds = array<i64: 64, 1>}, {pipeline_mode = #tpu.pipeline_mode<synchronous>, transform_indices = @transform_6, window_bounds = array<i64: 1, 1>}, {transform_indices = @transform_7, window_bounds = array<i64: 1, 384>}]} {
    %c0 = arith.constant 0 : index
    %c0_0 = arith.constant 0 : index
    %0 = vector.load %arg1[%c0, %c0_0] : memref<1x384xf32, #tpu.memory_space<vmem>>, vector<1x384xf32>
    %1 = arith.truncf %0 : vector<1x384xf32> to vector<1x384xbf16>
    %c0_1 = arith.constant 0 : index
    %c0_2 = arith.constant 0 : index
    %2 = vector.load %arg2[%c0_1, %c0_2] : memref<64x1xbf16, #tpu.memory_space<vmem>>, vector<64x1xbf16>
    %3 = vector.broadcast %2 : vector<64x1xbf16> to vector<64x384xbf16>
    %4 = vector.broadcast %1 : vector<1x384xbf16> to vector<64x384xbf16>
    %5 = arith.mulf %3, %4 : vector<64x384xbf16>
    %c0_3 = arith.constant 0 : index
    %c0_4 = arith.constant 0 : index
    %6 = vector.load %arg3[%c0_3, %c0_4] : memref<64x1xbf16, #tpu.memory_space<vmem>>, vector<64x1xbf16>
    %7 = vector.broadcast %6 : vector<64x1xbf16> to vector<64x384xbf16>
    %8 = arith.addf %5, %7 : vector<64x384xbf16>
    %cst = arith.constant 1.000980e-02 : bf16
    %9 = vector.broadcast %cst : bf16 to vector<64x384xbf16>
    %10 = arith.mulf %9, %8 : vector<64x384xbf16>
    %11 = arith.maximumf %8, %10 : vector<64x384xbf16>
    %c0_5 = arith.constant 0 : index
    %c0_6 = arith.constant 0 : index
    %12 = vector.load %arg4[%c0_5, %c0_6] : memref<64x64xbf16, #tpu.memory_space<vmem>>, vector<64x64xbf16>
    %cst_7 = arith.constant dense<0.000000e+00> : vector<64x384xf32>
    %13 = tpu.matmul %12, %11, %cst_7 {dimension_numbers = #tpu.dot_dimension_numbers<[1], [0], [0], [1], [0, 0, 1, 1], [], []>} : vector<64x64xbf16>, vector<64x384xbf16>, vector<64x384xf32> -> vector<64x384xf32>
    %c0_8 = arith.constant 0 : index
    %c0_9 = arith.constant 0 : index
    %14 = vector.load %arg5[%c0_8, %c0_9] : memref<64x1xf32, #tpu.memory_space<vmem>>, vector<64x1xf32>
    %15 = vector.broadcast %14 : vector<64x1xf32> to vector<64x384xf32>
    %16 = arith.addf %13, %15 : vector<64x384xf32>
    %cst_10 = arith.constant 0.00999999977 : f32
    %17 = vector.broadcast %cst_10 : f32 to vector<64x384xf32>
    %18 = arith.mulf %17, %16 : vector<64x384xf32>
    %19 = arith.maximumf %16, %18 : vector<64x384xf32>
    %c0_11 = arith.constant 0 : index
    %c0_12 = arith.constant 0 : index
    %20 = vector.load %arg6[%c0_11, %c0_12] : memref<64x1xf32, #tpu.memory_space<vmem>>, vector<64x1xf32>
    %21 = vector.broadcast %20 : vector<64x1xf32> to vector<64x384xf32>
    %22 = arith.mulf %21, %19 : vector<64x384xf32>
    %cst_13 = arith.constant dense<0.000000e+00> : vector<384xf32>
    %23 = vector.multi_reduction <add>, %22, %cst_13 [0] : vector<64x384xf32> to vector<384xf32>
    %24 = vector.shape_cast %23 : vector<384xf32> to vector<1x384xf32>
    %c0_14 = arith.constant 0 : index
    %c0_15 = arith.constant 0 : index
    %25 = vector.load %arg7[%c0_14, %c0_15] : memref<1x1xf32, #tpu.memory_space<vmem>>, vector<1x1xf32>
    %26 = vector.broadcast %25 : vector<1x1xf32> to vector<1x384xf32>
    %27 = arith.addf %24, %26 : vector<1x384xf32>
    %c0_16 = arith.constant 0 : index
    %c0_17 = arith.constant 0 : index
    %28 = vector.load %arg8[%c0_16, %c0_17] : memref<1x384xf32, #tpu.memory_space<vmem>>, vector<1x384xf32>
    tpu.vector_store %arg8[%c0_16, %c0_17], %27 {strides = array<i32>} : memref<1x384xf32, #tpu.memory_space<vmem>>, vector<1x384xf32>,
    return
  }
  func.func @transform_0(%arg0: i32) -> (i32, i32) {
    %c0_i32 = arith.constant 0 : i32
    %c0_i32_0 = arith.constant 0 : i32
    return %c0_i32, %arg0 : i32, i32
  }
  func.func @transform_1(%arg0: i32) -> (i32, i32) {
    %c0_i32 = arith.constant 0 : i32
    %c0_i32_0 = arith.constant 0 : i32
    %c0_i32_1 = arith.constant 0 : i32
    return %c0_i32, %c0_i32_0 : i32, i32
  }
  func.func @transform_2(%arg0: i32) -> (i32, i32) {
    %c0_i32 = arith.constant 0 : i32
    %c0_i32_0 = arith.constant 0 : i32
    %c0_i32_1 = arith.constant 0 : i32
    return %c0_i32, %c0_i32_0 : i32, i32
  }
  func.func @transform_3(%arg0: i32) -> (i32, i32) {
    %c0_i32 = arith.constant 0 : i32
    %c0_i32_0 = arith.constant 0 : i32
    %c0_i32_1 = arith.constant 0 : i32
    return %c0_i32, %c0_i32_0 : i32, i32
  }
  func.func @transform_4(%arg0: i32) -> (i32, i32) {
    %c0_i32 = arith.constant 0 : i32
    %c0_i32_0 = arith.constant 0 : i32
    %c0_i32_1 = arith.constant 0 : i32
    return %c0_i32, %c0_i32_0 : i32, i32
  }
  func.func @transform_5(%arg0: i32) -> (i32, i32) {
    %c0_i32 = arith.constant 0 : i32
    %c0_i32_0 = arith.constant 0 : i32
    %c0_i32_1 = arith.constant 0 : i32
    return %c0_i32, %c0_i32_0 : i32, i32
  }
  func.func @transform_6(%arg0: i32) -> (i32, i32) {
    %c0_i32 = arith.constant 0 : i32
    %c0_i32_0 = arith.constant 0 : i32
    %c0_i32_1 = arith.constant 0 : i32
    return %c0_i32, %c0_i32_0 : i32, i32
  }
  func.func @transform_7(%arg0: i32) -> (i32, i32) {
    %c0_i32 = arith.constant 0 : i32
    %c0_i32_0 = arith.constant 0 : i32
    return %c0_i32, %arg0 : i32, i32
  }
}

</mosaic_0001>

<bundles_post_ra>
// kernel: tpu_custom_call.1
= control target key start
LH: loop header
LB: loop body
LE: loop exit
PB: predicated region body
PF: predicated region fallthrough
CT: control target
= control target key end

     0   :  { %s1222_s0 = inlined_call_operand.vmem [shape: f32[1,384], index: 0, kind: input, shape index: {}]   ;;  %s1223_s1 = inlined_call_operand.vmem [shape: bf16[64,1], index: 1, kind: input, shape index: {}]   ;;  %s1224_s2 = inlined_call_operand.vmem [shape: bf16[64,1], index: 2, kind: input, shape index: {}]   ;;  %s1225_s3 = inlined_call_operand.vmem [shape: bf16[64,64], index: 3, kind: input, shape index: {}]   ;;  %s1226_s4 = inlined_call_operand.vmem [shape: f32[64,1], index: 4, kind: input, shape index: {}]   ;;  %s1227_s5 = inlined_call_operand.vmem [shape: f32[64,1], index: 5, kind: input, shape index: {}]   ;;  %s1228_s6 = inlined_call_operand.<no memory space> [shape: f32[1,1], index: 6, kind: input, shape index: {}]   ;;  %s1229_s7 = inlined_call_operand.hbm [shape: f32[1,384], index: 7, kind: output, shape index: {}]  }
   0x1   :  { %v12_v0 = vstv %s1228_s6 }
   0x2   :  { %13 = vst [vmem:[#allocation2] sm:$0x1] %v12_v0 }
   0x3   :  { %v208_v1 = vld [vmem:[%s1224_s2 + $0x18] sm:$0xf]  ;;  %v945_v3 = vmov 0   ;;  %v209_v4 = vld [vmem:[%s1224_s2 + $0x1c] sm:$0xf] }
   0x4   :  { %v57_v2 = vld [vmem:[%s1223_s1 + $0x18] sm:$0xf]  ;;  %918 = vset.pattern.permute.xlu1 %v945_v3  ;;  %917 = vset.pattern.permute.xlu0 %v945_v3  ;;  %v58_v5 = vld [vmem:[%s1223_s1 + $0x1c] sm:$0xf]  ;;  %v56_v6 = vld [vmem:[%s1223_s1 + $0x14] sm:$0xf] }
   0x5   :  { %284 = vperm.xlu1 %918, %v208_v1   ;;  %133 = vperm.xlu0 %917, %v57_v2   ;;  %v55_v7 = vld [vmem:[%s1223_s1 + $0x10] sm:$0xf]  ;;  %v207_v8 = vld [vmem:[%s1224_s2 + $0x14] sm:$0xf] }
   0x6   :  { %539 = vmatprep.mubr.bf16.mxu0 %v945_v3  ;;  %v206_v9 = vld [vmem:[%s1224_s2 + $0x10] sm:$0xf] }
   0x9   :  { %296 = vperm.xlu1 %918, %v209_v4   ;;  %145 = vperm.xlu0 %917, %v58_v5  }
   0xd   :  { %121 = vperm.xlu1 %918, %v56_v6   ;;  %109 = vperm.xlu0 %917, %v55_v7  }
  0x11   :  { %272 = vperm.xlu1 %918, %v207_v8   ;;  %260 = vperm.xlu0 %917, %v206_v9  }
  0x12   :  { %14 = vsyncpa [#allocation4], 0  ;;  %v54_v10 = vld [vmem:[%s1223_s1 + $0xc] sm:$0xf]  ;;  %v53_v11 = vld [vmem:[%s1223_s1 + $0x8] sm:$0xf]  ;;  %v33_v36 = vlaneseq }
  0x13   :  { %v205_v12 = vld [vmem:[%s1224_s2 + $0xc] sm:$0xf]  ;;  %v204_v13 = vld [vmem:[%s1224_s2 + $0x8] sm:$0xf]  ;;  %v52_v14 = vld [vmem:[%s1223_s1 + $0x4] sm:$0xf] }
  0x14   :  { %v51_v15 = vld [vmem:[%s1223_s1] sm:$0xf]  ;;  %v203_v16 = vld [vmem:[%s1224_s2 + $0x4] sm:$0xf]  ;;  %v363_v18 = vld [vmem:[%s1226_s4 + $0x8] sm:$0xff]  ;;  %vm494_vm0 = vcmask 523264  }
  0x15   :  { %97 = vperm.xlu1 %918, %v54_v10   ;;  %85 = vperm.xlu0 %917, %v53_v11   ;;  %v202_v17 = vld [vmem:[%s1224_s2] sm:$0xf]  ;;  %v365_v20 = vld [vmem:[%s1226_s4 + $0x18] sm:$0xff]  ;;  %v364_v21 = vld [vmem:[%s1226_s4 + $0x10] sm:$0xff]  ;;  %v1099_v37 = vshrl.u32 %v33_v36, 7  ;;  %vm846_vm1 = vcmp.lt.s32.totalorder %v33_v36, 384 }
  0x16   :  { %v362_v19 = vld [vmem:[%s1226_s4] sm:$0xff]  ;;  %v367_v25 = vld [vmem:[%s1226_s4 + $0x28] sm:$0xff]  ;;  %v368_v27 = vld [vmem:[%s1226_s4 + $0x30] sm:$0xff]  ;;  %v946_v48 = vmov 839922192  }
  0x17   :  { %v1058_v22 = vld [vmem:[%s1225_s3] sm:$0xff]   ;;  %v694_v26 = vld [vmem:[%s1227_s5 + $0x8] sm:$0xff]  ;;  %v695_v28 = vld [vmem:[%s1227_s5 + $0x10] sm:$0xff]  ;;  %v1102_v38 = vsub.s32 0, %v1099_v37  ;;  %v39_v39 = vsub.s32 1, %v1099_v37  ;;  %v43_v40 = vsub.s32 2, %v1099_v37  ;;  %v65_v49 = vunpack.c.l.s4 %v946_v48 }
  0x18   :  { %v693_v23 = vld [vmem:[%s1227_s5] sm:$0xff]  ;;  %905 = vmatprep.mubr.msk.bf16.mxu1 %vm494_vm0, %v1058_v22  ;;  %v369_v29 = vld [vmem:[%s1226_s4 + $0x38] sm:$0xff]  ;;  %v698_v31 = vld [vmem:[%s1227_s5 + $0x28] sm:$0xff] }
  0x19   :  { %248 = vperm.xlu1 %918, %v205_v12   ;;  %236 = vperm.xlu0 %917, %v204_v13   ;;  %v366_v24 = vld [vmem:[%s1226_s4 + $0x20] sm:$0xff]  ;;  %v696_v30 = vld [vmem:[%s1227_s5 + $0x18] sm:$0xff]  ;;  %v699_v34 = vld [vmem:[%s1227_s5 + $0x30] sm:$0xff]  ;;  %v66_v53 = vunpack.c.0.s8 %v65_v49 }
  0x1a   :  { %v697_v32 = vld [vmem:[%s1227_s5 + $0x20] sm:$0xff]  ;;  %v700_v33 = vld [vmem:[%s1227_s5 + $0x38] sm:$0xff] }
  0x1b   :  { %v804_v35 = vld [vmem:[#allocation2] sm:$0x1]  ;;  %v1114_v57 = vsub.s32 %v66_v53, %v1099_v37 }
  0x1c   :  { %v31_v41 = vld [vmem:[%s1222_s0] sm:$0x7] }
  0x1d   :  { %73 = vperm.xlu1 %918, %v52_v14   ;;  %61 = vperm.xlu0 %917, %v51_v15   ;;  %v36_v42 = vrot.slane %v31_v41, %v1102_v38  ;;  %v40_v43 = vrot.slane %v31_v41, %v39_v39  ;;  %v44_v44 = vrot.slane %v31_v41, %v43_v40 }
  0x1f   :  { %v48_v45 = vpack.c.bf16 %v36_v42, %v36_v42  ;;  %v49_v46 = vpack.c.bf16 %v40_v43, %v40_v43  ;;  %v50_v47 = vpack.c.bf16 %v44_v44, %v44_v44 }
  0x21   :  { %224 = vperm.xlu1 %918, %v203_v16   ;;  %212 = vperm.xlu0 %917, %v202_v17   ;;  %v156_v50 = vpack.i.b16 %v48_v45, %v48_v45  ;;  %v163_v51 = vpack.i.b16 %v49_v46, %v49_v46  ;;  %v170_v52 = vpack.i.b16 %v50_v47, %v50_v47 }
  0x23   :  { %v161_v54 = vrot.slane %v156_v50, %v1102_v38  ;;  %v168_v55 = vrot.slane %v163_v51, %v1102_v38  ;;  %v175_v56 = vrot.slane %v170_v52, %v1102_v38 }
  0x25   :  { %377 = vperm.xlu1 %918, %v363_v18   ;;  %372 = vperm.xlu0 %917, %v362_v19   ;;  %v1116_v58 = vcombine.low %v161_v54, %v168_v55  ;;  %v1118_v59 = vcombine.low %v175_v56, %v175_v56 }
  0x29   :  { %387 = vperm.xlu1 %918, %v365_v20   ;;  %382 = vperm.xlu0 %917, %v364_v21  }
  0x2d   :  { %703 = vperm.xlu1 %918, %v693_v23   ;;  %392 = vperm.xlu0 %917, %v366_v24  }
  0x31   :  { %397 = vperm.xlu1 %918, %v367_v25   ;;  %708 = vperm.xlu0 %917, %v694_v26  }
  0x35   :  { %402 = vperm.xlu1 %918, %v368_v27   ;;  %713 = vperm.xlu0 %917, %v695_v28  }
  0x39   :  { %407 = vperm.xlu1 %918, %v369_v29   ;;  %718 = vperm.xlu0 %917, %v696_v30  }
  0x3d   :  { %728 = vperm.xlu1 %918, %v698_v31   ;;  %723 = vperm.xlu0 %917, %v697_v32  }
  0x41   :  { %738 = vperm.xlu1 %918, %v700_v33   ;;  %733 = vperm.xlu0 %917, %v699_v34  }
  0x45   :  { %807 = vperm.xlu0 %917, %v804_v35  }
  0x80   :  { %v285_v60 = vpop.permute.xlu1 %284  ;;  %v134_v61 = vpop.permute.xlu0 %133 }
  0x81   :  { %v142_v62 = vrot.slane %v134_v61, %v1114_v57  ;;  %v293_v1 = vrot.slane %v285_v60, %v1114_v57 }
  0x83   :  { %v198_v63 = vmul.bf16 %v1116_v58, %v142_v62  ;;  %v199_v0 = vmul.bf16 %v1118_v59, %v142_v62 }
  0x84   :  { %v297_v2 = vpop.permute.xlu1 %296  ;;  %v146_v4 = vpop.permute.xlu0 %145 }
  0x85   :  { %v154_v5 = vrot.slane %v146_v4, %v1114_v57  ;;  %v319_v6 = vadd.bf16 %v293_v1, %v199_v0  ;;  %v318_v7 = vadd.bf16 %v293_v1, %v198_v63  ;;  %v305_v8 = vrot.slane %v297_v2, %v1114_v57 }
  0x87   :  { %v200_v9 = vmul.bf16 %v1116_v58, %v154_v5  ;;  %v201_v10 = vmul.bf16 %v1118_v59, %v154_v5  ;;  %v334_v17 = vmul.bf16 1009007652, %v318_v7  ;;  %v335_v18 = vmul.bf16 1009007652, %v319_v6 }
  0x88   :  { %v122_v11 = vpop.permute.xlu1 %121  ;;  %v110_v12 = vpop.permute.xlu0 %109 }
  0x89   :  { %v321_v13 = vadd.bf16 %v305_v8, %v201_v10  ;;  %v130_v14 = vrot.slane %v122_v11, %v1114_v57  ;;  %v118_v15 = vrot.slane %v110_v12, %v1114_v57  ;;  %v320_v16 = vadd.bf16 %v305_v8, %v200_v9 }
  0x8a   :  { %v350_v30 = vmax.bf16 %v334_v17, %v318_v7  ;;  %v351_v32 = vmax.bf16 %v335_v18, %v319_v6 }
  0x8b   :  { %v196_v19 = vmul.bf16 %v1116_v58, %v130_v14  ;;  %v197_v20 = vmul.bf16 %v1118_v59, %v130_v14  ;;  %v336_v24 = vmul.bf16 1009007652, %v320_v16  ;;  %v337_v25 = vmul.bf16 1009007652, %v321_v13 }
  0x8c   :  { %v273_v21 = vpop.permute.xlu1 %272  ;;  %v261_v23 = vpop.permute.xlu0 %260  ;;  %v194_v26 = vmul.bf16 %v1116_v58, %v118_v15  ;;  %v195_v27 = vmul.bf16 %v1118_v59, %v118_v15 }
  0x8d   :  { %v281_v28 = vrot.slane %v273_v21, %v1114_v57  ;;  %v269_v29 = vrot.slane %v261_v23, %v1114_v57  ;;  %v352_v31 = vmax.bf16 %v336_v24, %v320_v16  ;;  %v353_v33 = vmax.bf16 %v337_v25, %v321_v13 }
  0x8f   :  { %v316_v34 = vadd.bf16 %v281_v28, %v196_v19  ;;  %v317_v35 = vadd.bf16 %v281_v28, %v197_v20  ;;  %v314_v39 = vadd.bf16 %v269_v29, %v194_v26  ;;  %v315_v40 = vadd.bf16 %v269_v29, %v195_v27 }
  0x90   :  { %v98_v41 = vpop.permute.xlu1 %97  ;;  %v86_v42 = vpop.permute.xlu0 %85  ;;  %v879_v43 = vcombine.high %v350_v30, %v352_v31  ;;  %v880_v44 = vcombine.low %v351_v32, %v353_v33  ;;  %v878_v45 = vcombine.low %v350_v30, %v352_v31 }
  0x91   :  { %v332_v46 = vmul.bf16 1009007652, %v316_v34  ;;  %v333_v47 = vmul.bf16 1009007652, %v317_v35  ;;  %v330_v48 = vmul.bf16 1009007652, %v314_v39  ;;  %v106_v49 = vrot.slane %v98_v41, %v1114_v57 }
  0x92   :  { %v331_v50 = vmul.bf16 1009007652, %v315_v40  ;;  %v94_v51 = vrot.slane %v86_v42, %v1114_v57  ;;  %515 = vmatprep.subr.bf16.mxu0 %v879_v43  ;;  %897 = vmatprep.subr.bf16.mxu1 %v880_v44 }
  0x93   :  { %v348_v52 = vmax.bf16 %v332_v46, %v316_v34  ;;  %v349_v53 = vmax.bf16 %v333_v47, %v317_v35  ;;  %v346_v54 = vmax.bf16 %v330_v48, %v314_v39  ;;  %v192_v55 = vmul.bf16 %v1116_v58, %v106_v49  ;;  %516 = vmatpush1.bf16.msra.mxu0 %v878_v45 }
  0x94   :  { %v347_v56 = vmax.bf16 %v331_v50, %v315_v40  ;;  %v193_v60 = vmul.bf16 %v1118_v59, %v106_v49  ;;  %v190_v61 = vmul.bf16 %v1116_v58, %v94_v51  ;;  %v191_v62 = vmul.bf16 %v1118_v59, %v94_v51  ;;  %898 = vmatpush3.bf16.msra.mxu1 %v880_v44  ;;  %v249_v63 = vpop.permute.xlu1 %248  ;;  %v237_v0 = vpop.permute.xlu0 %236  ;;  %v920_v50 = vld [vmem:[%s1225_s3 + $0x8] sm:$0xff]   ;;  %v921_v51 = vld [vmem:[%s1225_s3 + $0x10] sm:$0xff]  }
  0x95   :  { %v257_v1 = vrot.slane %v249_v63, %v1114_v57  ;;  %v245_v2 = vrot.slane %v237_v0, %v1114_v57  ;;  %v876_v4 = vcombine.high %v346_v54, %v348_v52  ;;  %v875_v5 = vcombine.low %v346_v54, %v348_v52  ;;  %v922_v52 = vld [vmem:[%s1225_s3 + $0x18] sm:$0xff]   ;;  %s948_s3 = smov [#allocation3]  }
  0x96   :  { %v877_v6 = vcombine.low %v347_v56, %v349_v53  ;;  %s855_s21 = sshll.u32 %s948_s3, 4  ;;  %s856_s21 = int_to_ptr.vmem [resolvable:$true] %s855_s21 }
  0x97   :  { %v312_v7 = vadd.bf16 %v257_v1, %v192_v55  ;;  %v313_v8 = vadd.bf16 %v257_v1, %v193_v60  ;;  %v310_v9 = vadd.bf16 %v245_v2, %v190_v61  ;;  %v311_v10 = vadd.bf16 %v245_v2, %v191_v62  ;;  %517 = vmatprep.subr.bf16.mxu0 %v876_v4  ;;  %s923_s22 = scalar_lea.vmem %s856_s21, 48  ;;  %s927_s23 = scalar_lea.vmem %s856_s21, 64 }
  0x98   :  { %899 = vmatprep.subr.bf16.mxu1 %v877_v6  ;;  %v74_v11 = vpop.permute.xlu1 %73  ;;  %v62_v12 = vpop.permute.xlu0 %61  ;;  %518 = vmatpush1.bf16.msra.mxu0 %v875_v5  ;;  %p924_p0 = scmp.ne.s32.totalorder %s856_s21, %s923_s22  ;;  %p928_p1 = scmp.lt.s32.totalorder %s856_s21, %s856_s21 }
  0x99   :  { %v328_v13 = vmul.bf16 1009007652, %v312_v7  ;;  %v329_v14 = vmul.bf16 1009007652, %v313_v8  ;;  %v326_v15 = vmul.bf16 1009007652, %v310_v9  ;;  %v82_v16 = vrot.slane %v74_v11, %v1114_v57  ;;  %900 = vmatpush3.bf16.msra.mxu1 %v877_v6  ;;  %p929_p2 = scmp.lt.s32.totalorder %s927_s23, %s923_s22 }
  0x9a   :  { %v327_v17 = vmul.bf16 1009007652, %v311_v10  ;;  %v70_v18 = vrot.slane %v62_v12, %v1114_v57 }
  0x9b   :  { %v344_v19 = vmax.bf16 %v328_v13, %v312_v7  ;;  %v345_v20 = vmax.bf16 %v329_v14, %v313_v8  ;;  %v342_v21 = vmax.bf16 %v326_v15, %v310_v9  ;;  %v188_v23 = vmul.bf16 %v1116_v58, %v82_v16  ;;  %p930_p3 = por %p929_p2, %p928_p1 }
  0x9c   :  { %v343_v24 = vmax.bf16 %v327_v17, %v311_v10  ;;  %v189_v25 = vmul.bf16 %v1118_v59, %v82_v16  ;;  %v186_v26 = vmul.bf16 %v1116_v58, %v70_v18  ;;  %v187_v27 = vmul.bf16 %v1118_v59, %v70_v18  ;;  %v225_v28 = vpop.permute.xlu1 %224  ;;  %v213_v29 = vpop.permute.xlu0 %212 }
  0x9d   :  { %v233_v30 = vrot.slane %v225_v28, %v1114_v57  ;;  %v221_v31 = vrot.slane %v213_v29, %v1114_v57  ;;  %v873_v32 = vcombine.high %v342_v21, %v344_v19  ;;  %v872_v33 = vcombine.low %v342_v21, %v344_v19  ;;  %p931_p4 = pnand %p930_p3, %p924_p0 }
  0x9e   :  { %v874_v34 = vcombine.low %v343_v24, %v345_v20 }
  0x9f   :  { %v308_v35 = vadd.bf16 %v233_v30, %v188_v23  ;;  %v309_v39 = vadd.bf16 %v233_v30, %v189_v25  ;;  %v306_v40 = vadd.bf16 %v221_v31, %v186_v26  ;;  %v307_v41 = vadd.bf16 %v221_v31, %v187_v27  ;;  %519 = vmatprep.subr.bf16.mxu0 %v873_v32 }
  0xa0   :  { %901 = vmatprep.subr.bf16.mxu1 %v874_v34  ;;  %520 = vmatpush1.bf16.msra.mxu0 %v872_v33  ;;  %v378_v53 = vpop.permute.xlu1 %377 }
  0xa1   :  { %v324_v42 = vmul.bf16 1009007652, %v308_v35  ;;  %v325_v58 = vmul.bf16 1009007652, %v309_v39  ;;  %v322_v43 = vmul.bf16 1009007652, %v306_v40  ;;  %902 = vmatpush3.bf16.msra.mxu1 %v874_v34 }
  0xa2   :  { %v323_v59 = vmul.bf16 1009007652, %v307_v41 }
  0xa3   :  { %v340_v44 = vmax.bf16 %v324_v42, %v308_v35  ;;  %v341_v45 = vmax.bf16 %v325_v58, %v309_v39  ;;  %v338_v46 = vmax.bf16 %v322_v43, %v306_v40 }
  0xa4   :  { %v339_v47 = vmax.bf16 %v323_v59, %v307_v41  ;;  %v1172_v55 = vpop.permute.xlu1 %387 }
  0xa5   :  { %v870_v57 = vcombine.high %v338_v46, %v340_v44  ;;  %v869_v48 = vcombine.low %v338_v46, %v340_v44 }
  0xa6   :  { %v871_v49 = vcombine.low %v339_v47, %v341_v45 }
  0xa7   :  { %521 = vmatprep.subr.bf16.mxu0 %v870_v57 }
  0xa8   :  { %903 = vmatprep.subr.bf16.mxu1 %v871_v49  ;;  %522 = vmatpush1.bf16.msra.mxu0 %v869_v48  ;;  %v704_v60 = vpop.permute.xlu1 %703 }
  0xa9   :  { %904 = vmatpush3.bf16.msra.mxu1 %v871_v49 }
  0xab   :  { %881 = vmatmul.mubr.msk.bf16.vlgmr.msra.gmra.mxu0 %vm494_vm0, %v1058_v22  ;;  %v373_v22 = vpop.permute.xlu0 %372 }
  0xac   :  { %906 = vmatmul.mubr.msk.bf16.vlgmr.msra.gmra.mxu1 %vm494_vm0, %v920_v50  ;;  %549 = vmatprep.mubr.bf16.mxu0 %v945_v3  ;;  %v1178_v0 = vpop.permute.xlu1 %397 }
  0xad   :  { %909 = vmatprep.mubr.msk.bf16.mxu1 %vm494_vm0, %v921_v51 }
  0xaf   :  { %v383_v54 = vpop.permute.xlu0 %382 }
  0xb0   :  { %v1183_v20 = vpop.permute.xlu1 %402 }
  0xb3   :  { %882 = vmatmul.mubr.msk.bf16.gmra.mxu0 %vm494_vm0, %v920_v50  ;;  %v1174_v56 = vpop.permute.xlu0 %392 }
  0xb4   :  { %910 = vmatmul.mubr.msk.bf16.gmra.mxu1 %vm494_vm0, %v922_v52  ;;  %559 = vmatprep.mubr.bf16.mxu0 %v945_v3  ;;  %v1192_v49 = vpop.permute.xlu1 %407 }
  0xb7   :  { %v1176_v61 = vpop.permute.xlu0 %708 }
  0xbb   :  { %883 = vmatmul.mubr.msk.bf16.gmra.mxu0 %vm494_vm0, %v921_v51  ;;  %v1180_v10 = vpop.permute.xlu0 %713 }
  0xbc   :  { %569 = vmatprep.mubr.bf16.mxu0 %v945_v3 }
  0xbf   :  { %v1188_v41 = vpop.permute.xlu0 %718 }
  0xc3   :  { %884 = vmatmul.mubr.msk.bf16.gmra.mxu0 %vm494_vm0, %v922_v52 }
 0x16b   :  { %v541_v62 = vpop.f32.mrf.mxu0 }
 0x16c   :  { %v907_v63 = vpop.f32.mrf.mxu1  ;;  %v542_v1 = vadd.f32 %v541_v62, %v373_v22 }
 0x16d   :  { %v543_v2 = vpop.f32.mrf.mxu0  ;;  %v623_v4 = vadd.f32 %v907_v63, %v383_v54 }
 0x16e   :  { %v544_v3 = vadd.f32 %v543_v2, %v373_v22  ;;  %v614_v5 = vpop.f32.mrf.mxu1  ;;  %v645_v11 = vmul.f32 0.01, %v542_v1 }
 0x16f   :  { %v615_v6 = vadd.f32 %v614_v5, %v373_v22  ;;  %v545_v7 = vpop.f32.mrf.mxu0  ;;  %v653_v15 = vmul.f32 0.01, %v623_v4 }
 0x170   :  { %v546_v8 = vadd.f32 %v545_v7, %v378_v53  ;;  %v908_v9 = vpop.f32.mrf.mxu1  ;;  %v646_v16 = vmul.f32 0.01, %v544_v3  ;;  %v669_v33 = vmax.f32 %v542_v1, %v645_v11 }
 0x171   :  { %v647_v12 = vmul.f32 0.01, %v615_v6  ;;  %v626_v13 = vadd.f32 %v908_v9, %v1172_v55  ;;  %v547_v14 = vpop.f32.mrf.mxu0  ;;  %v677_v34 = vmax.f32 %v623_v4, %v653_v15 }
 0x172   :  { %v648_v17 = vmul.f32 0.01, %v546_v8  ;;  %v548_v18 = vadd.f32 %v547_v14, %v378_v53  ;;  %v617_v19 = vpop.f32.mrf.mxu1  ;;  %v670_v35 = vmax.f32 %v544_v3, %v646_v16 }
 0x173   :  { %v671_v21 = vmax.f32 %v615_v6, %v647_v12  ;;  %v656_v23 = vmul.f32 0.01, %v626_v13  ;;  %v618_v24 = vadd.f32 %v617_v19, %v378_v53  ;;  %v551_v25 = vpop.f32.mrf.mxu0  ;;  %v749_v62 = vmul.f32 %v1180_v10, %v677_v34 }
 0x174   :  { %v672_v26 = vmax.f32 %v546_v8, %v648_v17  ;;  %v649_v27 = vmul.f32 0.01, %v548_v18  ;;  %v552_v28 = vadd.f32 %v551_v25, %v383_v54  ;;  %v911_v29 = vpop.f32.mrf.mxu1  ;;  %v742_v63 = vmul.f32 %v704_v60, %v670_v35 }
 0x175   :  { %v650_v30 = vmul.f32 0.01, %v618_v24  ;;  %v1186_v31 = vadd.f32 %v911_v29, %v1183_v20  ;;  %v553_v32 = vpop.f32.mrf.mxu0  ;;  %v743_v42 = vmul.f32 %v704_v60, %v671_v21  ;;  %v680_v58 = vmax.f32 %v626_v13, %v656_v23  ;;  %v724_v13 = vpop.permute.xlu0 %723 }
 0x176   :  { %v554_v39 = vadd.f32 %v553_v32, %v383_v54  ;;  %v630_v40 = vpop.f32.mrf.mxu1  ;;  %v744_v45 = vmul.f32 %v1176_v61, %v672_v26  ;;  %v673_v46 = vmax.f32 %v548_v18, %v649_v27  ;;  %v651_v47 = vmul.f32 0.01, %v552_v28 }
 0x177   :  { %v674_v43 = vmax.f32 %v618_v24, %v650_v30  ;;  %v631_v59 = vadd.f32 %v630_v40, %v1174_v56  ;;  %v555_v44 = vpop.f32.mrf.mxu0  ;;  %v665_v51 = vmul.f32 0.01, %v1186_v31  ;;  %v741_v54 = vmul.f32 %v704_v60, %v669_v33  ;;  %v729_v24 = vpop.permute.xlu1 %728 }
 0x178   :  { %v652_v57 = vmul.f32 0.01, %v554_v39  ;;  %v912_v48 = vpop.f32.mrf.mxu1  ;;  %v556_v22 = vadd.f32 %v555_v44, %v1172_v55  ;;  %v752_v4 = vmul.f32 %v1188_v41, %v680_v58  ;;  %v675_v9 = vmax.f32 %v552_v28, %v651_v47 }
 0x179   :  { %v746_v50 = vmul.f32 %v1176_v61, %v674_v43  ;;  %v659_v52 = vmul.f32 0.01, %v631_v59  ;;  %v557_v53 = vpop.f32.mrf.mxu0  ;;  %v642_v1 = vadd.f32 %v912_v48, %v1192_v49  ;;  %v765_v8 = vadd.f32 %v744_v45, %v741_v54 }
 0x17a   :  { %v633_v2 = vpop.f32.mrf.mxu1  ;;  %v654_v6 = vmul.f32 0.01, %v556_v22  ;;  %v676_v11 = vmax.f32 %v554_v39, %v652_v57  ;;  %v558_v12 = vadd.f32 %v557_v53, %v1172_v55  ;;  %v745_v14 = vmul.f32 %v1176_v61, %v673_v46 }
 0x17b   :  { %v791_v3 = vadd.f32 %v746_v50, %v743_v42  ;;  %v683_v5 = vmax.f32 %v631_v59, %v659_v52  ;;  %v561_v7 = vpop.f32.mrf.mxu0  ;;  %v689_v60 = vmax.f32 %v1186_v31, %v665_v51  ;;  %v634_v16 = vadd.f32 %v633_v2, %v1178_v0  ;;  %v734_v59 = vpop.permute.xlu0 %733 }
 0x17c   :  { %v668_v19 = vmul.f32 0.01, %v642_v1  ;;  %v655_v21 = vmul.f32 0.01, %v558_v12  ;;  %v562_v23 = vadd.f32 %v561_v7, %v1174_v56  ;;  %v678_v26 = vmax.f32 %v556_v22, %v654_v6  ;;  %v739_v51 = vpop.permute.xlu1 %738 }
 0x17d   :  { %v792_v15 = vadd.f32 %v791_v3, %v749_v62  ;;  %v563_v17 = vpop.f32.mrf.mxu0  ;;  %v755_v18 = vmul.f32 %v724_v13, %v683_v5  ;;  %v662_v27 = vmul.f32 0.01, %v634_v16  ;;  %v747_v61 = vmul.f32 %v1180_v10, %v675_v9 }
 0x17e   :  { %v564_v55 = vadd.f32 %v563_v17, %v1174_v56  ;;  %v748_v29 = vmul.f32 %v1180_v10, %v676_v11  ;;  %v657_v30 = vmul.f32 0.01, %v562_v23  ;;  %v679_v33 = vmax.f32 %v558_v12, %v655_v21 }
 0x17f   :  { %v793_v25 = vadd.f32 %v792_v15, %v752_v4  ;;  %v565_v28 = vpop.f32.mrf.mxu0  ;;  %v686_v34 = vmax.f32 %v634_v16, %v662_v27  ;;  %v692_v40 = vmax.f32 %v642_v1, %v668_v19  ;;  %v778_v56 = vadd.f32 %v745_v14, %v742_v63 }
 0x180   :  { %v566_v31 = vadd.f32 %v565_v28, %v1178_v0  ;;  %v658_v35 = vmul.f32 0.01, %v564_v55  ;;  %v681_v42 = vmax.f32 %v562_v23, %v657_v30  ;;  %v750_v44 = vmul.f32 %v1188_v41, %v678_v26 }
 0x181   :  { %v794_v32 = vadd.f32 %v793_v25, %v755_v18  ;;  %v567_v39 = vpop.f32.mrf.mxu0  ;;  %v758_v45 = vmul.f32 %v729_v24, %v686_v34  ;;  %v766_v47 = vadd.f32 %v765_v8, %v747_v61  ;;  %v761_v57 = vmul.f32 %v734_v59, %v689_v60 }
 0x182   :  { %v660_v58 = vmul.f32 0.01, %v566_v31  ;;  %v568_v43 = vadd.f32 %v567_v39, %v1178_v0  ;;  %v682_v46 = vmax.f32 %v564_v55, %v658_v35  ;;  %v751_v52 = vmul.f32 %v1188_v41, %v679_v33 }
 0x183   :  { %v571_v10 = vpop.f32.mrf.mxu0  ;;  %v795_v22 = vadd.f32 %v794_v32, %v758_v45  ;;  %v753_v53 = vmul.f32 %v724_v13, %v681_v42  ;;  %v779_v0 = vadd.f32 %v778_v56, %v748_v29  ;;  %v764_v1 = vmul.f32 %v739_v51, %v692_v40 }
 0x184   :  { %v684_v48 = vmax.f32 %v566_v31, %v660_v58  ;;  %v661_v50 = vmul.f32 0.01, %v568_v43  ;;  %v572_v54 = vadd.f32 %v571_v10, %v1183_v20  ;;  %v767_v4 = vadd.f32 %v766_v47, %v750_v44  ;;  %v808_v47 = vpop.permute.xlu0 %807 }
 0x185   :  { %v573_v62 = vpop.f32.mrf.mxu0  ;;  %v796_v3 = vadd.f32 %v795_v22, %v761_v57  ;;  %v754_v5 = vmul.f32 %v724_v13, %v682_v46  ;;  %v780_v41 = vadd.f32 %v779_v0, %v751_v52  ;;  %v947_v44 = vmov 1966171168  }
 0x186   :  { %v685_v63 = vmax.f32 %v568_v43, %v661_v50  ;;  %v574_v2 = vadd.f32 %v573_v62, %v1183_v20  ;;  %v663_v6 = vmul.f32 0.01, %v572_v54  ;;  %v756_v8 = vmul.f32 %v729_v24, %v684_v48 }
 0x187   :  { %v575_v7 = vpop.f32.mrf.mxu0  ;;  %v797_v12 = vadd.f32 %v796_v3, %v764_v1  ;;  %v768_v14 = vadd.f32 %v767_v4, %v753_v53  ;;  %v781_v21 = vadd.f32 %v780_v41, %v754_v5  ;;  %v822_v45 = vunpack.c.l.s4 %v947_v44 }
 0x188   :  { %v664_v9 = vmul.f32 0.01, %v574_v2  ;;  %v576_v11 = vadd.f32 %v575_v7, %v1192_v49  ;;  %v687_v15 = vmax.f32 %v572_v54, %v663_v6  ;;  %v757_v16 = vmul.f32 %v729_v24, %v685_v63 }
 0x189   :  { %v577_v60 = vpop.f32.mrf.mxu0  ;;  %v798_v20 = vrot.slane %v797_v12, 4  ;;  %v769_v13 = vadd.f32 %v768_v14, %v756_v8  ;;  %v823_v52 = vunpack.c.0.s8 %v822_v45 }
 0x18a   :  { %v688_v17 = vmax.f32 %v574_v2, %v664_v9  ;;  %v666_v18 = vmul.f32 0.01, %v576_v11  ;;  %v578_v19 = vadd.f32 %v577_v60, %v1192_v49  ;;  %v759_v23 = vmul.f32 %v734_v59, %v687_v15 }
 0x18b   :  { %v799_v55 = vadd.f32 %v798_v20, %v797_v12  ;;  %v782_v28 = vadd.f32 %v781_v21, %v757_v16  ;;  %v826_v0 = vsub.s32 %v823_v52, %v1099_v37 }
 0x18c   :  { %v760_v25 = vmul.f32 %v734_v59, %v688_v17  ;;  %v690_v26 = vmax.f32 %v576_v11, %v666_v18  ;;  %v667_v27 = vmul.f32 0.01, %v578_v19  ;;  %v770_v61 = vadd.f32 %v769_v13, %v759_v23 }
 0x18d   :  { %v800_v31 = vrot.slane %v799_v55, 2 }
 0x18e   :  { %v762_v29 = vmul.f32 %v739_v51, %v690_v26  ;;  %v691_v30 = vmax.f32 %v578_v19, %v667_v27  ;;  %v783_v32 = vadd.f32 %v782_v28, %v760_v25 }
 0x18f   :  { %v801_v40 = vadd.f32 %v800_v31, %v799_v55 }
 0x190   :  { %v771_v33 = vadd.f32 %v770_v61, %v762_v29  ;;  %v763_v24 = vmul.f32 %v739_v51, %v691_v30  ;;  %v813_v51 = vrot.slane %v808_v47, %v1102_v38 }
 0x191   :  { %v802_v56 = vrot.slane %v801_v40, 1 }
 0x192   :  { %v772_v34 = vrot.slane %v771_v33, 4  ;;  %v784_v35 = vadd.f32 %v783_v32, %v763_v24 }
 0x193   :  { %v803_v50 = vadd.f32 %v802_v56, %v801_v40 }
 0x194   :  { %v773_v39 = vadd.f32 %v772_v34, %v771_v33  ;;  %v785_v49 = vrot.slane %v784_v35, 4 }
 0x195   :  { %v816_v62 = vadd.f32 %v813_v51, %v803_v50 }
 0x196   :  { %v774_v42 = vrot.slane %v773_v39, 2  ;;  %v786_v58 = vadd.f32 %v785_v49, %v784_v35 }
 0x197   :  { %v834_v2 = vrot.slane %v816_v62, %v826_v0 }
 0x198   :  { %v775_v43 = vadd.f32 %v774_v42, %v773_v39  ;;  %v787_v59 = vrot.slane %v786_v58, 2 }
 0x19a   :  { %v776_v46 = vrot.slane %v775_v43, 1  ;;  %v788_v10 = vadd.f32 %v787_v59, %v786_v58 }
 0x19c   :  { %v777_v57 = vadd.f32 %v776_v46, %v775_v43  ;;  %v789_v48 = vrot.slane %v788_v10, 1 }
 0x19e   :  { %v790_v22 = vadd.f32 %v789_v48, %v788_v10  ;;  %v814_v53 = vadd.f32 %v813_v51, %v777_v57 }
 0x1a0   :  { %v815_v54 = vadd.f32 %v813_v51, %v790_v22 }
 0x1a2   :  { %v820_v1 = vcombine.low %v814_v53, %v815_v54 }
 0x1a4   :  { %v827_v63 = vrot.slane %v820_v1, %v826_v0 }
 0x1a6   :  { %v835_v4 = vcombine.low %v827_v63, %v834_v2 }
 0x1a8   :  { %v842_v3 = vrot.slane %v835_v4, %v826_v0 }
 0x1aa   :  { %848 = vst.msk [vmem:[#allocation3] sm:$0x7] %vm846_vm1, %v842_v3 }
 0x1ab   :  { %934 = shalt.err (!%p931_p4)
}
 0x1ac   :  { %858 = dma.vmem_to_hbm [thread:$0]  %s856_s21, 48, %s1229_s7, [#allocation4]  }
 0x1ad   :  { %943 = dma.done.wait [#allocation4], 48  }
 0x1ae   :  { %944 = vsyncadd [#allocation4], 4294967248 }
 0x1af   :  { %862 = vsyncpa [#allocation4], 1 }

</bundles_post_ra>
